<compile_context>
chip_gen: v5e
topology: v5e:2x2
jax: 0.10.0
libtpu: 0.0.40
codegen_flags: <defaults>
</compile_context>

<pallas_src>
import functools
from typing import Dict, NamedTuple, Optional, Tuple

import jax
import jax.numpy as jnp
from jax.experimental import pallas as pl
from jax.experimental.pallas import tpu as pltpu


def _round_up(x: int, m: int) -> int:
    return ((x + m - 1) // m) * m


class PackedCategoricalEmbedding(NamedTuple):
    """Init-time packed parameters (build once, reuse every forward call)."""
    w: jax.Array                    # (k_pad, n_pad) f32 block-diagonal weight
    feature_names: Tuple[str, ...]  # sorted feature names (concat order)
    sizes: Tuple[int, ...]          # n_classes per feature
    offsets: Tuple[int, ...]        # starting row of each feature's block
    embed_dim: int
    out_dim: int                    # F * embed_dim (unpadded)


def pack_categorical_embedding_weights(
    weights: Dict[str, jax.Array], embed_dim: int
) -> PackedCategoricalEmbedding:
    """Builds the block-diagonal weight ONCE (parameter-only glue; hoisted out
    of the per-call path as recommended).

    weights[k] has the PyTorch nn.Linear layout (embed_dim, n_classes[k]); the
    packed matrix satisfies concat_k(x_k) @ w == concat_k(x_k @ weights[k].T).
    Rows are padded to a multiple of 8 and columns to a multiple of 128 so the
    kernel's matmul and stores are tile- / lane-aligned.
    """
    names = tuple(sorted(weights.keys()))
    sizes = tuple(int(weights[k].shape[1]) for k in names)
    offsets = []
    off = 0
    for n_k in sizes:
        offsets.append(off)
        off += n_k
    total_n = off
    out_dim = len(names) * embed_dim

    k_pad = _round_up(total_n, 8)
    n_pad = _round_up(out_dim, 128)

    w = jnp.zeros((k_pad, n_pad), dtype=jnp.float32)
    for i, name in enumerate(names):
        n_k = sizes[i]
        w = w.at[
            offsets[i]:offsets[i] + n_k, i * embed_dim:(i + 1) * embed_dim
        ].set(weights[name].astype(jnp.float32).T)

    return PackedCategoricalEmbedding(
        w=w, feature_names=names, sizes=sizes, offsets=tuple(offsets),
        embed_dim=embed_dim, out_dim=out_dim)


# ---------------------------------------------------------------------------
# Pallas kernel: indices -> on-chip one-hot -> single MXU matmul
# ---------------------------------------------------------------------------
def _categorical_embed_kernel(idx_ref, w_ref, o_ref, *, offsets):
    """idx_ref: (bb, F) int32 category indices
       w_ref:   (k_pad, n_pad) f32 packed block-diagonal weight (resident)
       o_ref:   (bb, n_pad) f32 lane-dense output block
    """
    idx = idx_ref[...]                                      # (bb, F) int32
    bb = idx.shape[0]
    k_pad = w_ref.shape[0]

    # Synthesize the concatenated one-hot on-chip (VPU): no HBM one-hot traffic.
    cols = jax.lax.broadcasted_iota(jnp.int32, (bb, k_pad), 1)
    onehot = jnp.zeros((bb, k_pad), dtype=jnp.float32)
    for f, off in enumerate(offsets):                       # F small & static
        onehot = onehot + (cols == (idx[:, f:f + 1] + off)).astype(jnp.float32)

    # Single f32 matmul on the MXU; output block is 128-lane dense.
    o_ref[...] = jnp.dot(onehot, w_ref[...], preferred_element_type=jnp.float32)


def categorical_embedding_from_indices(
    idx: jax.Array,
    packed: PackedCategoricalEmbedding,
    *,
    block_b: Optional[int] = None,
) -> jax.Array:
    """Fast path: (B, F) int32 category indices -> (B, F*embed_dim) f32."""
    batch, num_feats = idx.shape
    assert num_feats == len(packed.feature_names)
    k_pad, n_pad = packed.w.shape
    kernel = functools.partial(_categorical_embed_kernel, offsets=packed.offsets)

    if block_b is None or block_b >= batch or batch % block_b != 0:
        # Small batch: grid-less, whole arrays resident in VMEM (no per-step
        # pipeline bookkeeping).
        out = pl.pallas_call(
            kernel,
            out_shape=jax.ShapeDtypeStruct((batch, n_pad), jnp.float32),
            in_specs=[
                pl.BlockSpec(memory_space=pltpu.MemorySpace.VMEM),
                pl.BlockSpec(memory_space=pltpu.MemorySpace.VMEM),
            ],
            out_specs=pl.BlockSpec(memory_space=pltpu.MemorySpace.VMEM),
        )(idx, packed.w)
    else:
        # Large batch: tile over batch; "parallel" lets megacore (v7x's 2 TCs)
        # shard the axis. The packed weight stays resident (block index fixed).
        out = pl.pallas_call(
            kernel,
            out_shape=jax.ShapeDtypeStruct((batch, n_pad), jnp.float32),
            grid=(batch // block_b,),
            in_specs=[
                pl.BlockSpec((block_b, num_feats), lambda i: (i, 0)),
                pl.BlockSpec((k_pad, n_pad), lambda i: (0, 0)),
            ],
            out_specs=pl.BlockSpec((block_b, n_pad), lambda i: (i, 0)),
            compiler_params=pltpu.CompilerParams(
                dimension_semantics=("parallel",)),
        )(idx, packed.w)

    return out[:, :packed.out_dim]


def categorical_embedding_pallas(
    x: Dict[str, jax.Array],
    packed: PackedCategoricalEmbedding,
    *,
    block_b: Optional[int] = None,
) -> jax.Array:
    """Module-compatible entry point: dict of one-hot tensors -> embeddings.

    Assumes each row of x[k] is a valid one-hot vector (the module's documented
    contract), so argmax recovers the category exactly. Callers that already
    hold integer category ids should call `categorical_embedding_from_indices`
    directly and skip this tiny glue entirely.
    """
    idx = jnp.stack(
        [jnp.argmax(x[k], axis=-1).astype(jnp.int32) for k in packed.feature_names],
        axis=-1,
    )
    return categorical_embedding_from_indices(idx, packed, block_b=block_b)


# ---------------------------------------------------------------------------
# Reference (pure JAX) for correctness check
# ---------------------------------------------------------------------------
def categorical_embedding_ref(x, weights):
    keys = sorted(x.keys())
    return jnp.concatenate([x[k] @ weights[k].T for k in keys], axis=-1)


if __name__ == "__main__":
    # Module config (synthetic, deterministic).
    n_classes = {"allergen": 7, "site": 3, "ige_class": 5}
    embed_dim = 32
    batch = 8

    key = jax.random.PRNGKey(0)

    # Deterministic per-feature Linear weights: (embed_dim, n_classes[k]).
    weights = {}
    for name in sorted(n_classes.keys()):
        key, sub = jax.random.split(key)
        weights[name] = 0.1 * jax.random.normal(
            sub, (embed_dim, n_classes[name]), dtype=jnp.float32)

    # Deterministic categories and their one-hot encodings.
    idx_cols = {}
    x = {}
    for name in sorted(n_classes.keys()):
        key, sub = jax.random.split(key)
        ic = jax.random.randint(sub, (batch,), 0, n_classes[name]).astype(jnp.int32)
        idx_cols[name] = ic
        x[name] = jax.nn.one_hot(ic, n_classes[name], dtype=jnp.float32)

    # --- init-time packing (done ONCE, not per call) -------------------------
    packed = pack_categorical_embedding_weights(weights, embed_dim)

    ref = categorical_embedding_ref(x, weights)

    # 1) module-compatible path (dict of one-hot tensors)
    out = categorical_embedding_pallas(x, packed)
    out = jax.block_until_ready(out)
    assert out.shape == (batch, len(n_classes) * embed_dim), out.shape
    assert jnp.allclose(out, ref, atol=1e-5, rtol=1e-5), "mismatch vs reference"

    # 2) recommended fast path (int32 indices straight in)
    idx = jnp.stack([idx_cols[k] for k in packed.feature_names], axis=-1)
    out2 = jax.block_until_ready(categorical_embedding_from_indices(idx, packed))
    assert jnp.allclose(out2, ref, atol=1e-5, rtol=1e-5), "index-path mismatch"

    # 3) batch-tiled path (grid over batch, 'parallel' for megacore / v7x)
    big_b = 512
    big_cols = []
    for name in packed.feature_names:
        key, sub = jax.random.split(key)
        big_cols.append(
            jax.random.randint(sub, (big_b,), 0, n_classes[name]).astype(jnp.int32))
    big_idx = jnp.stack(big_cols, axis=-1)
    big_out = jax.block_until_ready(
        categorical_embedding_from_indices(big_idx, packed, block_b=256))
    big_x = {name: jax.nn.one_hot(big_idx[:, i], n_classes[name], dtype=jnp.float32)
             for i, name in enumerate(packed.feature_names)}
    big_ref = categorical_embedding_ref(big_x, weights)
    assert big_out.shape == (big_b, len(n_classes) * embed_dim), big_out.shape
    assert jnp.allclose(big_out, big_ref, atol=1e-5, rtol=1e-5), "tiled mismatch"

    print("KERNEL_OK")
</pallas_src>

<mosaic_0001>
module attributes {stable_mosaic.version = 11 : i64} {
  func.func @_categorical_embed_kernel(%arg0: memref<8x3xi32, #tpu.memory_space<vmem>>, %arg1: memref<16x128xf32, #tpu.memory_space<vmem>>, %arg2: memref<8x128xf32, #tpu.memory_space<vmem>>) attributes {dimension_semantics = [], scalar_prefetch = 0 : i64, scratch_operands = 0 : i64, tpu.core_type = #tpu.core_type<tc>} {
    %c0 = arith.constant 0 : index
    %c0_0 = arith.constant 0 : index
    %0 = vector.load %arg0[%c0, %c0_0] : memref<8x3xi32, #tpu.memory_space<vmem>>, vector<8x3xi32>
    %1 = tpu.iota {dimensions = array<i32: 1>} : vector<8x16xi32>
    %cst = arith.constant 0.000000e+00 : f32
    %2 = vector.broadcast %cst : f32 to vector<8x16xf32>
    %3 = vector.extract_strided_slice %0 {offsets = [0, 0], sizes = [8, 1], strides = [1, 1]} : vector<8x3xi32> to vector<8x1xi32>
    %c0_i32 = arith.constant 0 : i32
    %4 = vector.broadcast %c0_i32 : i32 to vector<8x1xi32>
    %5 = arith.addi %3, %4 : vector<8x1xi32>
    %6 = vector.broadcast %5 : vector<8x1xi32> to vector<8x16xi32>
    %7 = arith.cmpi eq, %1, %6 : vector<8x16xi32>
    %8 = arith.extui %7 : vector<8x16xi1> to vector<8x16xi32>
    %9 = arith.sitofp %8 : vector<8x16xi32> to vector<8x16xf32>
    %10 = arith.addf %2, %9 : vector<8x16xf32>
    %11 = vector.extract_strided_slice %0 {offsets = [0, 1], sizes = [8, 1], strides = [1, 1]} : vector<8x3xi32> to vector<8x1xi32>
    %c7_i32 = arith.constant 7 : i32
    %12 = vector.broadcast %c7_i32 : i32 to vector<8x1xi32>
    %13 = arith.addi %11, %12 : vector<8x1xi32>
    %14 = vector.broadcast %13 : vector<8x1xi32> to vector<8x16xi32>
    %15 = arith.cmpi eq, %1, %14 : vector<8x16xi32>
    %16 = arith.extui %15 : vector<8x16xi1> to vector<8x16xi32>
    %17 = arith.sitofp %16 : vector<8x16xi32> to vector<8x16xf32>
    %18 = arith.addf %10, %17 : vector<8x16xf32>
    %19 = vector.extract_strided_slice %0 {offsets = [0, 2], sizes = [8, 1], strides = [1, 1]} : vector<8x3xi32> to vector<8x1xi32>
    %c12_i32 = arith.constant 12 : i32
    %20 = vector.broadcast %c12_i32 : i32 to vector<8x1xi32>
    %21 = arith.addi %19, %20 : vector<8x1xi32>
    %22 = vector.broadcast %21 : vector<8x1xi32> to vector<8x16xi32>
    %23 = arith.cmpi eq, %1, %22 : vector<8x16xi32>
    %24 = arith.extui %23 : vector<8x16xi1> to vector<8x16xi32>
    %25 = arith.sitofp %24 : vector<8x16xi32> to vector<8x16xf32>
    %26 = arith.addf %18, %25 : vector<8x16xf32>
    %c0_1 = arith.constant 0 : index
    %c0_2 = arith.constant 0 : index
    %27 = vector.load %arg1[%c0_1, %c0_2] : memref<16x128xf32, #tpu.memory_space<vmem>>, vector<16x128xf32>
    %cst_3 = arith.constant dense<0.000000e+00> : vector<8x128xf32>
    %28 = tpu.matmul %26, %27, %cst_3 {dimension_numbers = #tpu.dot_dimension_numbers<[1], [0], [0], [1], [0, 0, 1, 1], [], []>} : vector<8x16xf32>, vector<16x128xf32>, vector<8x128xf32> -> vector<8x128xf32>
    %c0_4 = arith.constant 0 : index
    %c0_5 = arith.constant 0 : index
    %29 = vector.load %arg2[%c0_4, %c0_5] : memref<8x128xf32, #tpu.memory_space<vmem>>, vector<8x128xf32>
    tpu.vector_store %arg2[%c0_4, %c0_5], %28 {strides = array<i32>} : memref<8x128xf32, #tpu.memory_space<vmem>>, vector<8x128xf32>,
    return
  }
}

</mosaic_0001>

<bundles_post_ra>
// kernel: tpu_custom_call.1
= control target key start
LH: loop header
LB: loop body
LE: loop exit
PB: predicated region body
PF: predicated region fallthrough
CT: control target
= control target key end

     0   :  { %7 = vsyncpa [#allocation3], 0  ;;  %s198_s0 = inlined_call_operand.vmem [shape: s32[8,3], index: 0, kind: input, shape index: {}]   ;;  %s199_s1 = inlined_call_operand.hbm [shape: f32[16,128], index: 1, kind: input, shape index: {}]   ;;  %s200_s2 = inlined_call_operand.hbm [shape: f32[8,128], index: 2, kind: output, shape index: {}]  }
   0x1   :  { %8 = vsyncpa [#allocation4], 0  ;;  %s15_s11 = sshll.u32 %s199_s1, 4  ;;  %s166_s12 = smov [#allocation2]   ;;  %s16_s11 = int_to_ptr.hbm [resolvable:$true] %s15_s11 }
   0x2   :  { %s17_s13 = sshll.u32 %s166_s12, 4  ;;  %s167_s14 = smov 128   ;;  %s18_s13 = int_to_ptr.vmem [resolvable:$true] %s17_s13 }
   0x3   :  { %s168_s15 = smov 8  }
   0x4   :  { %23 = dma.hbm_to_vmem [thread:$0]  %s16_s11, 256, %s18_s13, [#allocation3], %s167_s14, %s167_s14, %s168_s15  }
   0x5   :  { %162 = dma.done.wait [#allocation3], 256  }
   0x6   :  { %163 = vsyncadd [#allocation3], 4294967040  ;;  %v169_v0 = vmov 0   ;;  %v170_v1 = vmov 2   ;;  %v28_v2 = vld [vmem:[%s198_s0] sm:$0xff]  ;;  %v171_v5 = vmov 1   ;;  %v29_v8 = vlaneseq }
   0x7   :  { %110 = vset.pattern.permute.xlu0 %v169_v0  ;;  %112 = vset.pattern.permute.xlu1 %v170_v1  ;;  %v46_v3 = vadd.s32 12, %v28_v2  ;;  %v38_v4 = vadd.s32 7, %v28_v2  ;;  %v55_v6 = vld [vmem:[#allocation2 + $0x8] sm:$0xff]  ;;  %v54_v7 = vld [vmem:[#allocation2] sm:$0xff]  ;;  %v172_v13 = vmov 0.0   ;;  %vm56_vm3 = vcmask 130048  }
   0x8   :  { %32 = vperm.xlu0 %110, %v28_v2   ;;  %74 = vmatpush.msra.mxu0 %v55_v6  ;;  %v30_v10 = vand.u32 127, %v29_v8  ;;  %s173_s0 = smov [#allocation5]   ;;  %s88_s20 = sshll.u32 %s200_s2, 4  ;;  %s89_s20 = int_to_ptr.hbm [resolvable:$true] %s88_s20 }
   0x9   :  { %48 = vperm.xlu1 %112, %v46_v3   ;;  %s86_s1 = sshll.u32 %s173_s0, 4  ;;  %s87_s1 = int_to_ptr.vmem [resolvable:$true] %s86_s1 }
   0xa   :  { %75 = vmatpush.msra.mxu0 %v54_v7 }
  0x10   :  { %111 = vset.pattern.permute.xlu0 %v171_v5 }
  0x11   :  { %40 = vperm.xlu0 %111, %v38_v4  }
  0x19   :  { %113 = vset.pattern.permute.xlu0 %v170_v1 }
  0x7a   :  { %v33_v9 = vpop.permute.xlu0 %32 }
  0x7b   :  { %v49_v11 = vpop.permute.xlu1 %48  ;;  %vm34_vm0 = vcmp.eq.s32.totalorder %v30_v10, %v33_v9 }
  0x7c   :  { %vm50_vm1 = vcmp.eq.s32.totalorder %v30_v10, %v49_v11  ;;  %v98_v14 = vsel %vm34_vm0, 1.0, %v172_v13 }
  0x7d   :  { %v100_v16 = vsel %vm50_vm1, 1.0, %v172_v13 }
  0x83   :  { %v41_v12 = vpop.permute.xlu0 %40 }
  0x84   :  { %vm42_vm2 = vcmp.eq.s32.totalorder %v30_v10, %v41_v12 }
  0x85   :  { %v99_v15 = vsel %vm42_vm2, 1.0, %v172_v13 }
  0x86   :  { %v45_v17 = vadd.f32 %v99_v15, %v98_v14 }
  0x88   :  { %v53_v18 = vadd.f32 %v100_v16, %v45_v17 }
  0x8a   :  { %101 = vmatmul.msk.f32.vlgmr.msra.gmra.mxu0 %vm56_vm3, %v53_v18 }
 0x107   :  { %v77_v19 = vpop.f32.mrf.mxu0 }
 0x108   :  { %80 = vst [vmem:[#allocation5] sm:$0xff] %v77_v19 }
 0x109   :  { %91 = dma.vmem_to_hbm [thread:$0]  %s87_s1, 128, %s89_s20, [#allocation4]  }
 0x10a   :  { %164 = dma.done.wait [#allocation4], 128  }
 0x10b   :  { %165 = vsyncadd [#allocation4], 4294967168 }
 0x10c   :  { %96 = vsyncpa [#allocation3], 1 }
 0x10d   :  { %97 = vsyncpa [#allocation4], 1 }

</bundles_post_ra>
